<compile_context>
chip_gen: v6e
topology: v6e:2x2x1
jax: 0.10.0
libtpu: 0.0.40
codegen_flags: <defaults>
</compile_context>

<pallas_src>
import jax
import jax.numpy as jnp
from jax.experimental import pallas as pl
from jax.experimental.pallas import tpu as pltpu


_MAX_TILE_B = 512        # cap on batch tile (sublane dim)
_RESIDENT_MAX_K = 2048   # largest input dim kept whole (no K-reduction loop)
_VMEM_LIMIT = 48 << 20   # safe on v5e/v6e (128 MiB) and v7x (64 MiB)


def _round_up(x: int, m: int) -> int:
    return ((x + m - 1) // m) * m


def _cdiv(a: int, b: int) -> int:
    return -(-a // b)


# --------------------------------------------------------------------------
# Kernels
# --------------------------------------------------------------------------
def _linear_relu_kernel(x_ref, w_ref, b_ref, o_ref):
    # Weight-resident path: full K in one block, no reduction axis.
    # x_ref: (TB, K)   w_ref: (K, TN)  (MXU-native [K, N] -> no transpose)
    # b_ref: (1, TN)   o_ref: (TB, TN)
    y = jnp.dot(x_ref[...], w_ref[...], preferred_element_type=jnp.float32)
    o_ref[...] = jnp.maximum(y + b_ref[...], 0.0).astype(o_ref.dtype)


def _linear_relu_ktiled_kernel(x_ref, w_ref, b_ref, o_ref):
    # K-tiled path: accumulate directly into the f32 output block, which stays
    # resident across the (innermost, "arbitrary") K axis — no scratch acc.
    k = pl.program_id(2)
    partial = jnp.dot(x_ref[...], w_ref[...], preferred_element_type=jnp.float32)

    @pl.when(k == 0)
    def _():
        o_ref[...] = partial

    @pl.when(k > 0)
    def _():
        o_ref[...] += partial

    @pl.when(k == pl.num_programs(2) - 1)
    def _():
        o_ref[...] = jnp.maximum(o_ref[...] + b_ref[...], 0.0)


# --------------------------------------------------------------------------
# One-time parameter preparation (init-time, NOT the per-call hot path)
# --------------------------------------------------------------------------
def prepare_bottom_params(weight, bias, compute_dtype=jnp.float32):
    """Transpose + pad nn.Linear params once.

    weight: [D_hid, D_in] (native PyTorch layout)  ->  w_t: [D_in_p, D_hid_p]
    bias:   [D_hid]                                ->  b2d: [1, D_hid_p] f32

    * Transpose to [K, N] so the kernel RHS is MXU-native (no per-tile XLU
      transpose).
    * Pad hidden dim to a 128 multiple only when >= 128 (lane-dense stores);
      small hidden dims stay exact so the output needs no per-call slice.
    * Pad input dim only when it exceeds the weight-resident threshold (then
      the K-tiled path needs a 128-divisible K).
    * Optional bf16 weight (compute_dtype) for 2x MXU/HBM rate; accumulation
      in the kernel stays f32.
    """
    D_hid, D_in = weight.shape
    w_t = weight.T  # [D_in, D_hid], one-time cost

    D_hid_p = _round_up(D_hid, 128) if D_hid >= 128 else D_hid
    D_in_p = _round_up(D_in, 128) if D_in > _RESIDENT_MAX_K else D_in

    if (D_in_p, D_hid_p) != (D_in, D_hid):
        w_t = jnp.pad(w_t, ((0, D_in_p - D_in), (0, D_hid_p - D_hid)))
    b = bias
    if D_hid_p != D_hid:
        b = jnp.pad(b, (0, D_hid_p - D_hid))
    b2d = b.reshape(1, D_hid_p).astype(jnp.float32)
    return w_t.astype(compute_dtype), b2d


# --------------------------------------------------------------------------
# Forward
# --------------------------------------------------------------------------
def bottom_model_forward(x, w_t, b2d, out_dim):
    """relu(x @ W.T + b), i.e. torch BottomModel.forward.

    x:       [B, D_in]        activations
    w_t:     [D_in_p, D_hid_p] prepared weight (from prepare_bottom_params)
    b2d:     [1, D_hid_p]      prepared bias
    out_dim: logical hidden dim (<= D_hid_p)
    """
    B, D_in = x.shape
    D_in_p, D_hid_p = w_t.shape

    if x.dtype != w_t.dtype:           # bf16 compute option
        x = x.astype(w_t.dtype)

    # ---- batch tiling: exact full-dim block when small; otherwise balanced
    #      tiles from cdiv so an unlucky B never pays ~2x padded work.
    if B <= _MAX_TILE_B:
        TILE_B, B_p, n_b = B, B, 1
    else:
        n_b = _cdiv(B, _MAX_TILE_B)
        TILE_B = _round_up(_cdiv(B, n_b), 8)
        B_p = TILE_B * n_b

    # ---- hidden (N) tiling: lane-dense tiles, <= 512 wide.
    if D_hid_p <= 512:
        TILE_N = D_hid_p
    elif D_hid_p % 512 == 0:
        TILE_N = 512
    elif D_hid_p % 256 == 0:
        TILE_N = 256
    else:
        TILE_N = 128            # D_hid_p is a 128 multiple whenever > 128
    n_n = D_hid_p // TILE_N

    # ---- v7x has 2 TensorCores: give the parallel axes >= 2 blocks when it
    #      is free to do so (no-op for the tiny demo shapes).
    if n_b == 1 and n_n == 1:
        if D_hid_p >= 256 and D_hid_p % 256 == 0:
            TILE_N, n_n = D_hid_p // 2, 2
        elif B >= 16 and B % 16 == 0:
            TILE_B, n_b = B // 2, 2

    # ---- pad activations only if actually required (no-op for small shapes).
    if (B_p, D_in_p) != (B, D_in):
        x = jnp.pad(x, ((0, B_p - B), (0, D_in_p - D_in)))

    out_shape = jax.ShapeDtypeStruct((B_p, D_hid_p), jnp.float32)

    if D_in_p <= _RESIDENT_MAX_K:
        # ---- weight-resident path: no K grid axis, no accumulator, weight
        #      slab DMA'd once per N tile (not once per batch tile).
        out = pl.pallas_call(
            _linear_relu_kernel,
            out_shape=out_shape,
            grid_spec=pltpu.PrefetchScalarGridSpec(
                num_scalar_prefetch=0,
                grid=(n_b, n_n),
                in_specs=[
                    pl.BlockSpec((TILE_B, D_in_p), lambda i, j: (i, 0)),
                    pl.BlockSpec((D_in_p, TILE_N), lambda i, j: (0, j)),
                    pl.BlockSpec((1, TILE_N), lambda i, j: (0, j)),
                ],
                out_specs=pl.BlockSpec((TILE_B, TILE_N), lambda i, j: (i, j)),
            ),
            compiler_params=pltpu.CompilerParams(
                dimension_semantics=("parallel", "parallel"),
                vmem_limit_bytes=_VMEM_LIMIT,
            ),
        )(x, w_t, b2d)
    else:
        # ---- K-tiled reduction path (very wide inputs). K is the trailing
        #      "arbitrary" axis; accumulate directly into the f32 output block.
        TILE_K = 128
        for cand in (2048, 1024, 512, 256, 128):
            if D_in_p % cand == 0:
                TILE_K = cand
                break
        n_k = D_in_p // TILE_K
        out = pl.pallas_call(
            _linear_relu_ktiled_kernel,
            out_shape=out_shape,
            grid_spec=pltpu.PrefetchScalarGridSpec(
                num_scalar_prefetch=0,
                grid=(n_b, n_n, n_k),
                in_specs=[
                    pl.BlockSpec((TILE_B, TILE_K), lambda i, j, k: (i, k)),
                    pl.BlockSpec((TILE_K, TILE_N), lambda i, j, k: (k, j)),
                    pl.BlockSpec((1, TILE_N), lambda i, j, k: (0, j)),
                ],
                out_specs=pl.BlockSpec((TILE_B, TILE_N), lambda i, j, k: (i, j)),
            ),
            compiler_params=pltpu.CompilerParams(
                dimension_semantics=("parallel", "parallel", "arbitrary"),
                vmem_limit_bytes=_VMEM_LIMIT,
            ),
        )(x, w_t, b2d)

    # Strip padding only if any was introduced (no-op slice otherwise skipped).
    if (B_p, D_hid_p) != (B, out_dim):
        out = out[:B, :out_dim]
    return out


if __name__ == "__main__":
    key = jax.random.PRNGKey(0)
    kx, kw, kb = jax.random.split(key, 3)

    batch = 8
    input_dim = 32
    bottom_hidden_dim = 32

    x = jax.random.normal(kx, (batch, input_dim), dtype=jnp.float32)
    # Deterministic synthetic params (mimics nn.Linear uniform init range).
    limit = 1.0 / jnp.sqrt(input_dim)
    weight = jax.random.uniform(
        kw, (bottom_hidden_dim, input_dim), dtype=jnp.float32,
        minval=-limit, maxval=limit)
    bias = jax.random.uniform(
        kb, (bottom_hidden_dim,), dtype=jnp.float32,
        minval=-limit, maxval=limit)

    # One-time parameter prep (init-time), then the hot-path forward.
    w_t, b2d = prepare_bottom_params(weight, bias)
    out = bottom_model_forward(x, w_t, b2d, out_dim=bottom_hidden_dim)
    jax.block_until_ready(out)

    # Reference check (torch.nn.Linear + ReLU semantics) in plain JAX.
    ref = jnp.maximum(x @ weight.T + bias, 0.0)
    assert out.shape == (batch, bottom_hidden_dim)
    assert jnp.allclose(out, ref, atol=1e-5, rtol=1e-5)

    print("KERNEL_OK")
</pallas_src>

<mosaic_0001>
module attributes {stable_mosaic.version = 11 : i64} {
  func.func @_linear_relu_kernel(%arg0: i32, %arg1: i32, %arg2: memref<8x32xf32, #tpu.memory_space<vmem>>, %arg3: memref<32x32xf32, #tpu.memory_space<vmem>>, %arg4: memref<1x32xf32, #tpu.memory_space<vmem>>, %arg5: memref<8x32xf32, #tpu.memory_space<vmem>>) attributes {dimension_semantics = [#tpu.dimension_semantics<parallel>, #tpu.dimension_semantics<parallel>], iteration_bounds = array<i64: 1, 1>, scalar_prefetch = 0 : i64, scratch_operands = 0 : i64, tpu.core_type = #tpu.core_type<tc>, window_params = [{transform_indices = @transform_0, window_bounds = array<i64: 8, 32>}, {transform_indices = @transform_1, window_bounds = array<i64: 32, 32>}, {transform_indices = @transform_2, window_bounds = array<i64: 1, 32>}, {transform_indices = @transform_3, window_bounds = array<i64: 8, 32>}]} {
    %c0 = arith.constant 0 : index
    %c0_0 = arith.constant 0 : index
    %0 = vector.load %arg2[%c0, %c0_0] : memref<8x32xf32, #tpu.memory_space<vmem>>, vector<8x32xf32>
    %c0_1 = arith.constant 0 : index
    %c0_2 = arith.constant 0 : index
    %1 = vector.load %arg3[%c0_1, %c0_2] : memref<32x32xf32, #tpu.memory_space<vmem>>, vector<32x32xf32>
    %cst = arith.constant dense<0.000000e+00> : vector<8x32xf32>
    %2 = tpu.matmul %0, %1, %cst {dimension_numbers = #tpu.dot_dimension_numbers<[1], [0], [0], [1], [0, 0, 1, 1], [], []>} : vector<8x32xf32>, vector<32x32xf32>, vector<8x32xf32> -> vector<8x32xf32>
    %c0_3 = arith.constant 0 : index
    %c0_4 = arith.constant 0 : index
    %3 = vector.load %arg4[%c0_3, %c0_4] : memref<1x32xf32, #tpu.memory_space<vmem>>, vector<1x32xf32>
    %4 = vector.broadcast %3 : vector<1x32xf32> to vector<8x32xf32>
    %5 = arith.addf %2, %4 : vector<8x32xf32>
    %cst_5 = arith.constant 0.000000e+00 : f32
    %6 = vector.broadcast %cst_5 : f32 to vector<8x32xf32>
    %7 = arith.maximumf %5, %6 : vector<8x32xf32>
    %c0_6 = arith.constant 0 : index
    %c0_7 = arith.constant 0 : index
    %8 = vector.load %arg5[%c0_6, %c0_7] : memref<8x32xf32, #tpu.memory_space<vmem>>, vector<8x32xf32>
    tpu.vector_store %arg5[%c0_6, %c0_7], %7 {strides = array<i32>} : memref<8x32xf32, #tpu.memory_space<vmem>>, vector<8x32xf32>,
    return
  }
  func.func @transform_0(%arg0: i32, %arg1: i32) -> (i32, i32) {
    %c0_i32 = arith.constant 0 : i32
    %c0_i32_0 = arith.constant 0 : i32
    return %arg0, %c0_i32 : i32, i32
  }
  func.func @transform_1(%arg0: i32, %arg1: i32) -> (i32, i32) {
    %c0_i32 = arith.constant 0 : i32
    %c0_i32_0 = arith.constant 0 : i32
    return %c0_i32, %arg1 : i32, i32
  }
  func.func @transform_2(%arg0: i32, %arg1: i32) -> (i32, i32) {
    %c0_i32 = arith.constant 0 : i32
    %c0_i32_0 = arith.constant 0 : i32
    return %c0_i32, %arg1 : i32, i32
  }
  func.func @transform_3(%arg0: i32, %arg1: i32) -> (i32, i32) {
    %c0_i32 = arith.constant 0 : i32
    return %arg0, %arg1 : i32, i32
  }
}

</mosaic_0001>

<bundles_post_ra>
// kernel: tpu_custom_call.1
= control target key start
LH: loop header
LB: loop body
LE: loop exit
PB: predicated region body
PF: predicated region fallthrough
CT: control target
= control target key end

     0   :  { %8 = vsyncpa [#allocation3], 0  ;;  %s275_s0 = inlined_call_operand.hbm [shape: f32[8,32], index: 0, kind: input, shape index: {}]   ;;  %s276_s1 = inlined_call_operand.hbm [shape: f32[32,32], index: 1, kind: input, shape index: {}]   ;;  %s277_s2 = inlined_call_operand.vmem [shape: f32[1,32], index: 2, kind: input, shape index: {}]   ;;  %s278_s3 = inlined_call_operand.hbm [shape: f32[8,32], index: 3, kind: output, shape index: {}]  }
   0x1   :  { %9 = vsyncpa [#allocation6], 0 }
   0x2   :  { %10 = vsyncpa [#allocation4], 0  ;;  %s236_s12 = smov [#allocation2]   ;;  %s237_s14 = smov [#allocation5]  }
   0x3   :  { %s17_s13 = sshll.u32 %s236_s12, 4  ;;  %s26_s15 = sshll.u32 %s237_s14, 4  ;;  %s18_s13 = int_to_ptr.vmem [resolvable:$true] %s17_s13  ;;  %s27_s15 = int_to_ptr.vmem [resolvable:$true] %s26_s15 }
   0x4   :  { %s178_s16 = scalar_lea.vmem %s18_s13, 128  ;;  %p183_p1 = scmp.lt.s32.totalorder %s18_s13, %s18_s13 }
   0x5   :  { %p179_p0 = scmp.ne.s32.totalorder %s18_s13, %s178_s16  ;;  %p184_p2 = scmp.lt.s32.totalorder %s178_s16, %s178_s16 }
   0x7   :  { %p185_p3 = por %p184_p2, %p183_p1 }
   0x9   :  { %p186_p4 = pnand %p185_p3, %p179_p0 }
   0xb   :  { %189 = shalt.err (!%p186_p4)
}
   0xc   :  { %20 = dma.hbm_to_vmem [thread:$0]  %s275_s0, 128, %s18_s13, [#allocation3]  }
   0xd   :  { %s198_s19 = scalar_lea.vmem %s27_s15, 512  ;;  %p203_p6 = scmp.lt.s32.totalorder %s27_s15, %s27_s15 }
   0xe   :  { %p199_p5 = scmp.ne.s32.totalorder %s27_s15, %s198_s19  ;;  %p204_p7 = scmp.lt.s32.totalorder %s198_s19, %s198_s19 }
  0x10   :  { %p205_p8 = por %p204_p7, %p203_p6 }
  0x12   :  { %p206_p9 = pnand %p205_p8, %p199_p5 }
  0x14   :  { %209 = shalt.err (!%p206_p9)
}
  0x15   :  { %s238_s20 = smov 128   ;;  %s239_s21 = smov 8  }
  0x16   :  { %32 = dma.hbm_to_vmem [thread:$0]  %s276_s1, 512, %s27_s15, [#allocation6], %s238_s20, %s238_s20, %s239_s21  }
  0x17   :  { %230 = dma.done.wait [#allocation3], 128  }
  0x18   :  { %231 = vsyncadd [#allocation3], 4294967168 }
  0x19   :  { %232 = dma.done.wait [#allocation6], 512  }
  0x1a   :  { %233 = vsyncadd [#allocation6], 4294966784  ;;  %v240_v0 = vmov 0.0   ;;  %vm241_vm0 = vmmov 0   ;;  %v45_v1 = vld [vmem:[#allocation5 + $0x18] sm:$0xff]  ;;  %v44_v2 = vld [vmem:[#allocation5 + $0x10] sm:$0xff] }
  0x1b   :  { %152 = vmatprep.subr.mxu0 %v240_v0  ;;  %160 = vmatprep.mubr.msk.f32.mxu0 %vm241_vm0, %v240_v0  ;;  %v43_v3 = vld [vmem:[#allocation5 + $0x8] sm:$0xff]  ;;  %v42_v4 = vld [vmem:[#allocation5] sm:$0xff]  ;;  %v41_v5 = vld [vmem:[#allocation2] sm:$0xff]  ;;  %vm53_vm1 = vcmask 261120   ;;  %s242_s24 = smov [#allocation7]  }
  0x1c   :  { %153 = vmatpush3.msra.mxu0 %v45_v1  ;;  %v145_v6 = vld [vmem:[%s277_s2] ss:$0 sm:$0xff]  ;;  %s135_s25 = sshll.u32 %s242_s24, 4  ;;  %s136_s25 = int_to_ptr.vmem [resolvable:$true] %s135_s25 }
  0x1d   :  { %154 = vmatprep.subr.mxu0 %v240_v0  ;;  %s210_s26 = scalar_lea.vmem %s136_s25, 128  ;;  %p215_p11 = scmp.lt.s32.totalorder %s136_s25, %s136_s25 }
  0x1e   :  { %155 = vmatpush3.msra.mxu0 %v44_v2  ;;  %p211_p10 = scmp.ne.s32.totalorder %s136_s25, %s210_s26  ;;  %p216_p12 = scmp.lt.s32.totalorder %s210_s26, %s210_s26 }
  0x1f   :  { %156 = vmatprep.subr.mxu0 %v240_v0 }
  0x20   :  { %157 = vmatpush3.msra.mxu0 %v43_v3  ;;  %p217_p13 = por %p216_p12, %p215_p11 }
  0x21   :  { %158 = vmatprep.subr.mxu0 %v240_v0 }
  0x22   :  { %159 = vmatpush3.msra.mxu0 %v42_v4  ;;  %p218_p0 = pnand %p217_p13, %p211_p10 }
  0x23   :  { %161 = vmatmul.mubr.msk.f32.vlgmr.msra.gmra.mxu0 %vm53_vm1, %v41_v5 }
  0xe3   :  { %v123_v7 = vpop.f32.mrf.mxu0 }
  0xe4   :  { %v124_v8 = vadd.f32 %v145_v6, %v123_v7 }
  0xe5   :  { %v162_v9 = vpop.f32.mrf.mxu0 }
  0xe6   :  { %v127_v10 = vmax.f32 %v124_v8, 0.0 }
  0xe8   :  { %128 = vst.msk [vmem:[#allocation7] sm:$0xff] %vm53_vm1, %v127_v10 }
  0xe9   :  { %221 = shalt.err (!%p218_p0)
}
  0xea   :  { %138 = dma.vmem_to_hbm [thread:$0]  %s136_s25, 128, %s278_s3, [#allocation4]  }
  0xeb   :  { %234 = dma.done.wait [#allocation4], 128  }
  0xec   :  { %235 = vsyncadd [#allocation4], 4294967168 }
  0xed   :  { %142 = vsyncpa [#allocation3], 1 }
  0xee   :  { %143 = vsyncpa [#allocation6], 1 }
  0xef   :  { %144 = vsyncpa [#allocation4], 1 }

</bundles_post_ra>
